<compile_context>
chip_gen: v6e
topology: v6e:2x2x1
jax: 0.10.0
libtpu: 0.0.40
codegen_flags: <defaults>
</compile_context>

<pallas_src>
import jax
import jax.numpy as jnp
from jax.experimental import pallas as pl
from jax.experimental.pallas import tpu as pltpu

LANE = 128
TARGET_BLOCK_BYTES = 4 * 1024 * 1024   # 4 MiB input block per grid step
MIN_GRID_STEPS = 4                     # keep >=4 steps so v7x's 2 TCs both get work
VMEM_LIMIT_BYTES = 40 * 1024 * 1024    # explicit scoped-VMEM limit (v7x phys = 64 MiB)


def _round_up(a, b):
    return ((a + b - 1) // b) * b


def _sublane_min(itemsize):
    # f32 -> 8 rows, bf16 -> 16, int8/fp8 -> 32 (packed dtypes pack along sublanes)
    return max(8, 32 // int(itemsize))


def _choose_tile_rows(rows, itemsize):
    sub = _sublane_min(itemsize)
    big = max(sub, (TARGET_BLOCK_BYTES // (LANE * int(itemsize))) // sub * sub)
    # Cap so the parallel axis has ~MIN_GRID_STEPS steps when possible (megacore),
    # but never below the sublane minimum (keeps (8,128) divisibility).
    cap = _round_up(pl.cdiv(rows, MIN_GRID_STEPS), sub)
    return max(sub, min(big, cap))


def _ptanh_kernel(scal_ref, x_ref, o_ref):
    # scal_ref: SMEM (2,) f32 = [p, 1/p] ; x_ref/o_ref: VMEM tiles (tile_rows, 128)
    p = scal_ref[0]
    inv_p = scal_ref[1]
    xf = x_ref[...].astype(jnp.float32)          # f32 compute -> single EUP tanh
    o_ref[...] = (p * jnp.tanh(xf * inv_p)).astype(o_ref.dtype)


def _ptanh_jnp(x, pf, inv_pf):
    return (pf * jnp.tanh(x.astype(jnp.float32) * inv_pf)).astype(x.dtype)


def ptanh(x, p):
    """Elementwise p * tanh(x / p).  x: any shape (float), p: scalar (p != 0)."""
    orig_shape = x.shape
    orig_dtype = x.dtype
    n = x.size
    itemsize = jnp.dtype(orig_dtype).itemsize
    sub = _sublane_min(itemsize)

    pf = jnp.asarray(p, dtype=jnp.float32).reshape(())
    inv_pf = 1.0 / pf                            # reciprocal hoisted out of the kernel

    rows = n // LANE
    rem = n - rows * LANE

    # Tiny input: a standalone memory-bound pallas_call is pure overhead here.
    if rows < sub:
        return _ptanh_jnp(x, pf, inv_pf)

    x_flat = jnp.ravel(x)
    aligned = rows * LANE
    x_main = x_flat[:aligned] if rem else x_flat   # 128-aligned prefix, no padding
    x2d = x_main.reshape(rows, LANE)

    tile_rows = _choose_tile_rows(rows, itemsize)
    grid = pl.cdiv(rows, tile_rows)                # partial last block masked by Pallas

    scal = jnp.stack([pf, inv_pf])                 # (2,) f32 -> SMEM

    cost = pl.CostEstimate(
        flops=3 * aligned,                         # 2 muls + 1 (folded) per element
        transcendentals=aligned,                   # one tanh per element
        bytes_accessed=2 * aligned * itemsize + 8, # read x + write out + scalars
    )

    out2d = pl.pallas_call(
        _ptanh_kernel,
        out_shape=jax.ShapeDtypeStruct((rows, LANE), orig_dtype),
        grid_spec=pltpu.PrefetchScalarGridSpec(
            num_scalar_prefetch=0,
            grid=(grid,),
            in_specs=[
                pl.BlockSpec(memory_space=pltpu.SMEM),               # [p, 1/p]
                pl.BlockSpec((tile_rows, LANE), lambda i: (i, 0)),   # x tile
                # If a profile ever shows exposed DMA at this block size, add
                # pipeline_mode=pl.Buffered(3) here instead of shrinking the tile.
            ],
            out_specs=pl.BlockSpec((tile_rows, LANE), lambda i: (i, 0)),
        ),
        compiler_params=pltpu.CompilerParams(
            dimension_semantics=("parallel",),
            vmem_limit_bytes=VMEM_LIMIT_BYTES,
        ),
        cost_estimate=cost,
    )(scal, x2d)

    if rem:
        # <=127-element tail handled in plain jnp (no full-tensor pad/slice passes).
        tail_out = _ptanh_jnp(x_flat[aligned:], pf, inv_pf)
        return jnp.concatenate([out2d.reshape(-1), tail_out]).reshape(orig_shape)
    return out2d.reshape(orig_shape)


if __name__ == "__main__":
    key = jax.random.PRNGKey(0)

    # Small NCHW-like activation input (numel % 128 == 0 -> pure kernel path).
    x = jax.random.normal(key, (2, 4, 16, 16), dtype=jnp.float32) * 3.0
    p = jnp.float32(1.0)  # learnable scalar p (deterministic init)
    out = jax.block_until_ready(ptanh(x, p))
    ref = p * jnp.tanh(x / p)
    assert out.shape == x.shape and out.dtype == x.dtype
    assert jnp.max(jnp.abs(out - ref)) < 1e-5

    # Misaligned-numel input (exercises aligned-prefix kernel + jnp tail + masked
    # partial last block), with a p whose reciprocal is exact.
    x2 = jax.random.normal(jax.random.PRNGKey(0), (3, 5, 7, 11), dtype=jnp.float32)
    p2 = jnp.float32(0.5)
    out2 = jax.block_until_ready(ptanh(x2, p2))
    ref2 = p2 * jnp.tanh(x2 / p2)
    assert out2.shape == x2.shape and out2.dtype == x2.dtype
    assert jnp.max(jnp.abs(out2 - ref2)) < 1e-5

    print("KERNEL_OK")
</pallas_src>

<mosaic_0001>
module attributes {stable_mosaic.version = 11 : i64} {
  func.func @_ptanh_kernel(%arg0: i32, %arg1: memref<2xf32, #tpu.memory_space<smem>>, %arg2: memref<8x128xf32, #tpu.memory_space<vmem>>, %arg3: memref<8x128xf32, #tpu.memory_space<vmem>>) attributes {dimension_semantics = [#tpu.dimension_semantics<parallel>], iteration_bounds = array<i64: 2>, scalar_prefetch = 0 : i64, scratch_operands = 0 : i64, tpu.core_type = #tpu.core_type<tc>, window_params = [{transform_indices = @transform_0, window_bounds = array<i64: 2>}, {transform_indices = @transform_1, window_bounds = array<i64: 8, 128>}, {transform_indices = @transform_2, window_bounds = array<i64: 8, 128>}]} {
    %c0 = arith.constant 0 : index
    %0 = memref.load %arg1[%c0] : memref<2xf32, #tpu.memory_space<smem>>
    %c1 = arith.constant 1 : index
    %1 = memref.load %arg1[%c1] : memref<2xf32, #tpu.memory_space<smem>>
    %c0_0 = arith.constant 0 : index
    %c0_1 = arith.constant 0 : index
    %2 = vector.load %arg2[%c0_0, %c0_1] : memref<8x128xf32, #tpu.memory_space<vmem>>, vector<8x128xf32>
    %3 = vector.broadcast %1 : f32 to vector<8x128xf32>
    %4 = arith.mulf %2, %3 : vector<8x128xf32>
    %5 = math.tanh %4 : vector<8x128xf32>
    %6 = vector.broadcast %0 : f32 to vector<8x128xf32>
    %7 = arith.mulf %6, %5 : vector<8x128xf32>
    %c0_2 = arith.constant 0 : index
    %c0_3 = arith.constant 0 : index
    %8 = vector.load %arg3[%c0_2, %c0_3] : memref<8x128xf32, #tpu.memory_space<vmem>>, vector<8x128xf32>
    tpu.vector_store %arg3[%c0_2, %c0_3], %7 {strides = array<i32>} : memref<8x128xf32, #tpu.memory_space<vmem>>, vector<8x128xf32>,
    return
  }
  func.func @transform_0(%arg0: i32) -> i32 {
    %c0_i32 = arith.constant 0 : i32
    %c0_i32_0 = arith.constant 0 : i32
    return %c0_i32 : i32
  }
  func.func @transform_1(%arg0: i32) -> (i32, i32) {
    %c0_i32 = arith.constant 0 : i32
    %c0_i32_0 = arith.constant 0 : i32
    return %arg0, %c0_i32 : i32, i32
  }
  func.func @transform_2(%arg0: i32) -> (i32, i32) {
    %c0_i32 = arith.constant 0 : i32
    %c0_i32_0 = arith.constant 0 : i32
    return %arg0, %c0_i32 : i32, i32
  }
}

</mosaic_0001>

<bundles_post_ra>
// kernel: tpu_custom_call.1
= control target key start
LH: loop header
LB: loop body
LE: loop exit
PB: predicated region body
PF: predicated region fallthrough
CT: control target
= control target key end

     0   :  { %7 = vsyncpa [#allocation5], 0  ;;  %s629_s0 = inlined_call_operand.hbm [shape: f32[2], index: 0, kind: input, shape index: {}]   ;;  %s630_s1 = inlined_call_operand.hbm [shape: f32[16,128], index: 1, kind: input, shape index: {}]   ;;  %s631_s2 = inlined_call_operand.hbm [shape: f32[16,128], index: 2, kind: output, shape index: {}]  }
   0x1   :  { %8 = vsyncpa [#allocation3], 0 }
   0x2   :  { %10 = vsyncpa [#allocation3 + $0x1], 0 }
   0x3   :  { %11 = vsyncpa [#allocation4], 0 }
   0x4   :  { %13 = vsyncpa [#allocation4 + $0x1], 0  ;;  %s477_s9 = smov 0   ;;  %s479_s10 = smov 0  }
   0x5   :  { %s481_s11 = smov 0   ;;  %s483_s12 = smov 0  }
   0x6 LB: > { %s498_s13 = sadd.s32 4294967295, %s457_s12   ;;  %s276_s14 = sadd.s32 4294967294, %s457_s12   ;;  %s457_s12 = sphi %s483_s12, %s651_s12   ;;  %s453_s11 = sphi %s481_s11, %s650_s11   ;;  %s449_s10 = sphi %s479_s10, %s649_s10   ;;  %s445_s9 = sphi %s477_s9, %s648_s9  }
   0x7   : > { %p60_p0 = scmp.ne.s32.totalorder %s449_s10, %s445_s9  ;;  %p632_p1 = scmp.eq.s32.totalorder %s498_s13, 0 }
   0x8   : > { %p84_p2 = scmp.eq.s32.totalorder %s498_s13, 1  ;;  %p90_p3 = scmp.eq.s32.totalorder %s276_s14, 1 }
   0x9   : > { %p507_p4 = por %p632_p1, %p60_p0  ;;  %p277_p5 = scmp.ge.s32.totalorder %s457_s12, 1 }
   0xa   : > { %p512_p6 = por %p90_p3, %p60_p0  ;;  %p97_p7 = scmp.lt.s32.totalorder %s457_s12, 3 }
   0xb   : > { %s636_s15 = scalar_select %p507_p4, 1, 0 }
   0xc   : > { %s637_s16 = scalar_select %p512_p6, 1, 0 }
   0xd   : > { %p517_p8 = pnand %p277_p5, %p97_p7  ;;  %s523_s18 = sadd.s32 1, %s457_s12  }
   0xe   : > { %s44_s19 = ssub.s32 %s457_s12, %s523_s18  ;;  %s47_s20 = sadd.s32 1, %s453_s11 }
   0xf   : > { %s638_s17 = scalar_select %p517_p8, 1, 0 }
  0x10   : > { %p299_p10 = pneg %p517_p8  ;;  %p45_p12 = scmp.eq.s32.totalorder %s44_s19, 0 }
  0x11   : > { %p54_p13 = scmp.ne.s32.totalorder %s453_s11, %s449_s10  ;;  %p55_p0 = scmp.eq.s32.totalorder %s457_s12, 0 }
  0x12   : > { %p300_p11 = pnand %p299_p10, %p632_p1  ;;  %p312_p3 = scmp.lt.s32.totalorder %s457_s12, 2 }
  0x13   : > { %s459_s21 = smov [#allocation2]   ;;  %p56_p5 = por %p55_p0, %p54_p13 }
  0x14   : > { %302 = dma.hbm_to_smem (!%p300_p11), %s629_s0, 16, %s459_s21, [#allocation5]  }
  0x15   : > { %s540_s24 = scalar_select %p45_p12, %s453_s11, %s47_s20  }
  0x16   : > { %p544_p7 = por %p84_p2, %p54_p13  ;;  %s119_s26 = sand.u32 1, %s453_s11  }
  0x17   : > { %s281_s27 = sshll.u32 %s457_s12, 7  ;;  %s280_s28 = sshll.u32 %s119_s26, 3 }
  0x18   : > { %s639_s25 = scalar_select %p544_p7, 1, 0 }
  0x19   : > { %s553_s3 = scalar_lea.hbm %s630_s1, %s281_s27  ;;  %s123_s4 = scalar_lea.vmem [#allocation6], %s280_s28 }
  0x1a   : > { %s130_s5 = sshll.u32 %s123_s4, 4  ;;  %p555_p10 = pnand %p312_p3, %p56_p5  ;;  %s131_s5 = int_to_ptr.vmem [resolvable:$true] %s130_s5 }
  0x1b   : > { %s120_s7 = scalar_lea.sflag [#allocation3], %s119_s26  ;;  %s361_s8 = scalar_lea.hbm %s553_s3, 128 }
  0x1c   : > { %p362_p2 = scmp.ne.s32.totalorder %s553_s3, %s361_s8  ;;  %p363_p11 = pneg %p555_p10 }
  0x1d   : > { %s366_s20 = scalar_lea.hbm %s630_s1, 256  ;;  %p367_p0 = scmp.lt.s32.totalorder %s553_s3, %s630_s1 }
  0x1e   : > { %p364_p12 = pnand %p363_p11, %p362_p2  ;;  %p368_p3 = scmp.lt.s32.totalorder %s366_s20, %s361_s8 }
  0x20   : > { %p365_p13 = pneg %p364_p12  ;;  %p369_p5 = por %p368_p3, %p367_p0 }
  0x22   : > { %p370_p9 = pnand %p369_p5, %p365_p13 }
  0x24   : > { %373 = shalt.err (!%p370_p9)
}
  0x25   : > { %s374_s23 = scalar_lea.vmem %s131_s5, 128  ;;  %s460_s26 = smov [#allocation6]  }
  0x26   : > { %p375_p1 = scmp.ne.s32.totalorder %s131_s5, %s374_s23  ;;  %s379_s27 = sshll.u32 %s460_s26, 4  ;;  %s380_s27 = int_to_ptr.vmem [resolvable:$false] %s379_s27 }
  0x27   : > { %s381_s28 = scalar_lea.vmem %s380_s27, 256  ;;  %p382_p2 = scmp.lt.s32.totalorder %s131_s5, %s380_s27 }
  0x28   : > { %p377_p6 = pnand %p375_p1, %p363_p11  ;;  %p383_p12 = scmp.lt.s32.totalorder %s381_s28, %s374_s23 }
  0x2a   : > { %p378_p7 = pneg %p377_p6  ;;  %p384_p4 = por %p383_p12, %p382_p2 }
  0x2c   : > { %p385_p8 = pnand %p384_p4, %p378_p7 }
  0x2e   : > { %388 = shalt.err (!%p385_p8)
}
  0x2f   : > { %306 = dma.hbm_to_vmem [thread:$0]  (!%p555_p10), %s553_s3, 128, %s131_s5, %s120_s7  }
  0x30   : > { %p641_p13 = scmp.ne.s32.totalorder %s638_s17, 0 }
  0x31   : > { %p642_p9 = scmp.eq.s32.totalorder (!%p641_p13), %s498_s13, 0 }
  0x32   : > { %139 = sbr.rel (%p641_p13) target bundleno = 100 (0x64), region = 28 }
  0x37   : > { %432 = dma.done.wait (%p642_p9), [#allocation5], 16   ;;  %p643_p1 = pmov %p642_p9 }
  0x38   : > { %s580_s29 = sand.u32 1, %s449_s10   ;;  %p644_p4 = scmp.ne.s32.totalorder %s636_s15, 0 }
  0x39   : > { %434 = vsyncadd (%p643_p1), [#allocation5], 4294967280  ;;  %s284_s30 = sshll.u32 %s580_s29, 3  ;;  %s146_s4 = scalar_lea.sflag [#allocation3], %s580_s29 }
  0x3a   : > { %s149_s6 = scalar_lea.vmem [#allocation6], %s284_s30 }
  0x3b   : > { %436 = dma.done.wait (%p644_p4), %s146_s4, 128  }
  0x3c   : > { %438 = vsyncadd (%p644_p4), %s146_s4, 4294967168 }
  0x3d   : > { %154 = sfence }
  0x3e   : > { %s286_s17 = sld [smem:[#allocation2 + $0x1]]  ;;  %v173_v0 = vld [vmem:[%s149_s6] sm:$0xff]  ;;  %s170_s5 = scalar_lea.vmem [#allocation7], %s284_s30 }
  0x3f   : > { %s171_s3 = sld [smem:[#allocation2]]  ;;  %s194_s7 = sshll.u32 %s170_s5, 4  ;;  %s589_s7 = int_to_ptr.vmem [resolvable:$true] %s194_s7 }
  0x40   : > { %s288_s8 = sshll.u32 %s498_s13, 7  ;;  %s181_s20 = scalar_lea.sflag [#allocation4], %s580_s29 }
  0x41   : > { %s192_s19 = scalar_lea.hbm %s631_s2, %s288_s8  ;;  %s389_s21 = scalar_lea.vmem %s589_s7, 128 }
  0x42   : > { %p390_p6 = scmp.ne.s32.totalorder %s589_s7, %s389_s21  ;;  %p645_p8 = scmp.ne.s32.totalorder %s639_s25, 0 }
  0x43   : > { %s461_s22 = smov [#allocation7]  }
  0x44   : > { %v174_v1 = vstv %s286_s17  ;;  %p391_p7 = pnand %p390_p6, %p645_p8  ;;  %s393_s13 = sshll.u32 %s461_s22, 4  ;;  %s394_s13 = int_to_ptr.vmem [resolvable:$false] %s393_s13 }
  0x45   : > { %v175_v2 = vmul.f32 %v174_v1, %v173_v0  ;;  %v177_v3 = vstv %s171_s3  ;;  %s395_s23 = scalar_lea.vmem %s394_s13, 256  ;;  %p396_p11 = scmp.lt.s32.totalorder %s589_s7, %s394_s13 }
  0x46   : > { %p392_p10 = pneg %p391_p7  ;;  %p397_p0 = scmp.lt.s32.totalorder %s395_s23, %s389_s21 }
  0x47   : > { %348 = vtanh.f32 %v175_v2 }
  0x48   : > { %p398_p3 = por %p397_p0, %p396_p11 }
  0x4a   : > { %p399_p5 = pnand %p398_p3, %p392_p10 }
  0x54   : > { %v349_v4 = vpop.eup %348 }
  0x55   : > { %v178_v5 = vmul.f32 %v349_v4, %v177_v3 }
  0x57   : > { %179 = vst [vmem:[%s170_s5] sm:$0xff] %v178_v5 }
  0x58   : > { %402 = shalt.err (!%p399_p5)
}
  0x59   : > { %s403_s26 = scalar_lea.hbm %s192_s19, 128  ;;  %s407_s29 = scalar_lea.hbm %s631_s2, 256 }
  0x5a   : > { %p404_p2 = scmp.ne.s32.totalorder %s192_s19, %s403_s26  ;;  %p408_p9 = scmp.lt.s32.totalorder %s192_s19, %s631_s2 }
  0x5b   : > { %p409_p1 = scmp.lt.s32.totalorder %s407_s29, %s403_s26 }
  0x5c   : > { %p405_p12 = pnand %p404_p2, %p645_p8 }
  0x5d   : > { %p410_p4 = por %p409_p1, %p408_p9 }
  0x5e   : > { %p406_p13 = pneg %p405_p12 }
  0x60   : > { %p411_p6 = pnand %p410_p4, %p406_p13 }
  0x62   : > { %414 = shalt.err (!%p411_p6)
}
  0x63   : > { %297 = dma.vmem_to_hbm [thread:$0]  (%p645_p8), %s589_s7, 128, %s192_s19, %s181_s20  }
  0x64 PF: > { %s206_s6 = sand.u32 1, %s445_s9   ;;  %p646_p7 = scmp.ne.s32.totalorder %s637_s16, 0 }
  0x65   : > { %p647_p10 = scmp.ge.s32.totalorder %s457_s12, 2  ;;  %s207_s17 = scalar_lea.sflag [#allocation4], %s206_s6 }
  0x67   : > { %p308_p11 = pnand %p647_p10, %p646_p7 }
  0x69   : > { %p309_p0 = pneg %p308_p11 }
  0x6b   : > { %440 = dma.done.wait (%p309_p0), %s207_s17, 128  }
  0x6c   : > { %442 = vsyncadd (%p309_p0), %s207_s17, 4294967168  ;;  %p16_p3 = scmp.ge.s32.totalorder %s523_s18, 4   ;;  %s648_s9 = smov %s449_s10 }
  0x6d   : > { %s649_s10 = smov %s453_s11  ;;  %s650_s11 = smov %s540_s24 }
  0x6e   : > { %s651_s12 = smov %s523_s18  ;;  %18 = sbr.rel (!%p16_p3) target bundleno = 6 (0x6), region = 78 }
  0x73   :  { %212 = vsyncpa [#allocation3], 1 }
  0x74   :  { %214 = vsyncpa [#allocation3 + $0x1], 1 }
  0x75   :  { %215 = vsyncpa [#allocation4], 1 }
  0x76   :  { %217 = vsyncpa [#allocation4 + $0x1], 1 }
  0x77   :  { %218 = vsyncpa [#allocation5], 1 }
  0x78   :  { %220 = vsyncpa [#allocation5 + $0x1], 1 }

</bundles_post_ra>
